<compile_context>
chip_gen: v7x
topology: tpu7x:2x2x1
jax: 0.10.0
libtpu: 0.0.40
codegen_flags: <defaults>
</compile_context>

<pallas_src>
import math

import jax
import jax.numpy as jnp
from jax import lax
from jax.experimental import pallas as pl
from jax.experimental.pallas import tpu as pltpu


# ----------------------------------------------------------------------------
# Helpers
# ----------------------------------------------------------------------------

def _pick_tile(size, max_tile):
    """Largest multiple-of-8 tile <= max_tile that divides `size`, else `size`.

    TODO(synk): if `size` is large with no multiple-of-8 divisor <= max_tile this
    falls back to one full-size tile; guard upstream for such (rare) shapes.
    """
    if size <= max_tile:
        return size
    t = (max_tile // 8) * 8
    while t >= 8:
        if size % t == 0:
            return t
        t -= 8
    return size


def _nbytes(shape, dtype):
    n = 1
    for d in shape:
        n *= int(d)
    return n * jnp.dtype(dtype).itemsize


def _vmem_limit_bytes(working_set_bytes):
    """Scoped-VMEM limit sized from actual blocks+scratch (2x headroom), clamped
    to ~3/4 of this generation's physical VMEM (64 MiB v7x, 128 MiB v5e/v6e)."""
    cap = 48 << 20
    try:
        cap = int(pltpu.get_tpu_info().vmem_capacity_bytes * 3 // 4)
    except Exception:
        pass
    return int(min(cap, max(16 << 20, 2 * int(working_set_bytes))))


# ----------------------------------------------------------------------------
# Kernel 1: head-major Q/K/V projections
# ----------------------------------------------------------------------------

def _proj_kernel(q_ref, k_ref, v_ref,
                 wq_ref, bq_ref, wk_ref, bk_ref, wv_ref, bv_ref,
                 qp_ref, kp_ref, vp_ref):
    """out[b, h, s_tile, :] = x[b, s_tile, :] @ W_h + b_h  (bf16 out, f32 acc)."""
    qp_ref[0, 0] = (jnp.dot(q_ref[0], wq_ref[0],
                            preferred_element_type=jnp.float32)
                    + bq_ref[0]).astype(qp_ref.dtype)
    kp_ref[0, 0] = (jnp.dot(k_ref[0], wk_ref[0],
                            preferred_element_type=jnp.float32)
                    + bk_ref[0]).astype(kp_ref.dtype)
    vp_ref[0, 0] = (jnp.dot(v_ref[0], wv_ref[0],
                            preferred_element_type=jnp.float32)
                    + bv_ref[0]).astype(vp_ref.dtype)


# ----------------------------------------------------------------------------
# Kernel 2: flash-style attention + fused output projection
# ----------------------------------------------------------------------------

def _attn_kernel(n_heads, hidden_dim, compute_dtype):
    cdt = compute_dtype

    def kernel(qp_ref, kp_ref, vp_ref, wo_ref, bo_ref, out_ref,
               m_sc, l_sc, acc_sc):
        ki = pl.program_id(2)

        @pl.when(ki == 0)
        def _():
            m_sc[...] = jnp.full_like(m_sc, -jnp.inf)
            l_sc[...] = jnp.zeros_like(l_sc)
            acc_sc[...] = jnp.zeros_like(acc_sc)

        q = qp_ref[0]            # (nh, tq, hd) bf16, 1/sqrt(hd) folded into Wq
        k = kp_ref[0]            # (nh, tk, hd) bf16
        v = vp_ref[0]            # (nh, tk, hd) bf16

        # Batched-over-heads QK^T keeps MXU passes back-to-back and every
        # load/store lane-aligned (head axis leading, head_dim is the full dim).
        s = jnp.einsum("hqd,hkd->hqk", q, k,
                       preferred_element_type=jnp.float32)       # (nh, tq, tk)
        m_prev = m_sc[...]
        m_new = jnp.maximum(m_prev, s.max(axis=-1, keepdims=True))
        alpha = jnp.exp(m_prev - m_new)
        p = jnp.exp(s - m_new)                                    # f32 softmax numerator
        l_sc[...] = alpha * l_sc[...] + p.sum(axis=-1, keepdims=True)
        acc_sc[...] = alpha * acc_sc[...] + jnp.einsum(
            "hqk,hkd->hqd", p.astype(cdt), v,
            preferred_element_type=jnp.float32)
        m_sc[...] = m_new
        # TODO(synk): attention mask and training-mode dropout not implemented
        #             (eval mode, mask=None).

        @pl.when(ki == pl.num_programs(2) - 1)
        def _():
            tq = acc_sc.shape[1]

            def head_out(h, acc):
                ctx_h = (acc_sc[h] * pl.reciprocal(l_sc[h], approx=True)
                         ).astype(cdt)                            # (tq, hd)
                return acc + jnp.dot(ctx_h, wo_ref[h],
                                     preferred_element_type=jnp.float32)

            out = jnp.zeros((tq, hidden_dim), jnp.float32)
            if n_heads <= 4:
                # Short, fixed trip count: unroll.
                for h in range(n_heads):
                    out = head_out(h, out)
            else:
                # Bound live ranges for larger head counts.
                out = lax.fori_loop(0, n_heads, head_out, out)
            out_ref[0] = (out + bo_ref[...]).astype(out_ref.dtype)

    return kernel


# ----------------------------------------------------------------------------
# Wrapper
# ----------------------------------------------------------------------------

_SINGLE_BUFFER_CONST = True   # flipped off if pl.Buffered(1) is unsupported


def multi_head_attention(query, key, value, params, n_heads, *,
                         max_q_tile=128, max_kv_tile=256, max_proj_tile=256,
                         compute_dtype=jnp.bfloat16):
    """query/key/value: [B, S, H] float32.  params: PyTorch-layout weights."""
    global _SINGLE_BUFFER_CONST
    B, S, H = query.shape
    assert H % n_heads == 0, "hidden_dim must be divisible by n_heads"
    hd = H // n_heads
    scale = 1.0 / math.sqrt(hd)
    cdt = compute_dtype

    # ---- one-time weight prep (PyTorch Linear: y = x @ W.T + b) ----
    # Head-major input-projection weights: wq_h[h] = Wq.T[:, h*hd:(h+1)*hd]
    # (scale folded into Q).  Head-major output weights: wo_h[h] = Wo.T[h*hd:(h+1)*hd, :].
    def _split_in(w, b, s=1.0):
        w_h = (w.T * s).reshape(H, n_heads, hd).transpose(1, 0, 2).astype(cdt)
        b_h = (b * s).reshape(n_heads, 1, hd).astype(jnp.float32)
        return w_h, b_h

    wq_h, bq_h = _split_in(params["wq"], params["bq"], scale)
    wk_h, bk_h = _split_in(params["wk"], params["bk"])
    wv_h, bv_h = _split_in(params["wv"], params["bv"])
    wo_h = params["wo"].T.reshape(n_heads, hd, H).astype(cdt)
    bo = params["bo"].reshape(1, H).astype(jnp.float32)

    # bf16 activations: halves HBM->VMEM DMA bytes and VMEM block footprint.
    q_in = query.astype(cdt)
    k_in = key.astype(cdt)
    v_in = value.astype(cdt)

    # ---- kernel 1: head-major Q/K/V projections -> (B, nh, S, hd) bf16 ----
    tp = _pick_tile(S, max_proj_tile)
    x_spec = pl.BlockSpec((1, tp, H), lambda b, si, h: (b, si, 0))
    w_spec = pl.BlockSpec((1, H, hd), lambda b, si, h: (h, 0, 0))
    b_spec = pl.BlockSpec((1, 1, hd), lambda b, si, h: (h, 0, 0))
    o_spec = pl.BlockSpec((1, 1, tp, hd), lambda b, si, h: (b, h, si, 0))

    proj_ws = 3 * 2 * (_nbytes((tp, H), cdt) + _nbytes((H, hd), cdt)
                       + _nbytes((1, hd), jnp.float32) + _nbytes((tp, hd), cdt))
    qp, kp, vp = pl.pallas_call(
        _proj_kernel,
        out_shape=tuple(jax.ShapeDtypeStruct((B, n_heads, S, hd), cdt)
                        for _ in range(3)),
        grid_spec=pltpu.PrefetchScalarGridSpec(
            num_scalar_prefetch=0,
            grid=(B, S // tp, n_heads),
            in_specs=[x_spec, x_spec, x_spec,
                      w_spec, b_spec, w_spec, b_spec, w_spec, b_spec],
            out_specs=(o_spec, o_spec, o_spec)),
        compiler_params=pltpu.CompilerParams(
            dimension_semantics=("parallel", "parallel", "arbitrary"),
            vmem_limit_bytes=_vmem_limit_bytes(proj_ws)),
    )(q_in, k_in, v_in, wq_h, bq_h, wk_h, bk_h, wv_h, bv_h)

    # ---- kernel 2: flash-style attention + fused output projection ----
    tq = _pick_tile(S, max_q_tile)
    tk = _pick_tile(S, max_kv_tile)

    attn_ws = (2 * (_nbytes((n_heads, tq, hd), cdt)
                    + 2 * _nbytes((n_heads, tk, hd), cdt)
                    + _nbytes((n_heads, hd, H), cdt)
                    + _nbytes((1, H), jnp.float32)
                    + _nbytes((tq, H), query.dtype))
               + _nbytes((n_heads, tq, hd), jnp.float32)          # acc scratch
               + 2 * _nbytes((n_heads, tq, 128), jnp.float32)     # m/l (lane-padded)
               + 3 * _nbytes((n_heads, tq, tk), jnp.float32))     # logits temporaries
    vmem_limit = _vmem_limit_bytes(attn_ws)

    def attn_call(single_buffer_const):
        qp_spec = pl.BlockSpec((1, n_heads, tq, hd), lambda b, qi, ki: (b, 0, qi, 0))
        kv_spec = pl.BlockSpec((1, n_heads, tk, hd), lambda b, qi, ki: (b, 0, ki, 0))
        if single_buffer_const:
            # Constant-index blocks: single buffer saves one dead copy of wo/bo.
            wo_spec = pl.BlockSpec((n_heads, hd, H), lambda b, qi, ki: (0, 0, 0),
                                   pipeline_mode=pl.Buffered(1))
            bo_spec = pl.BlockSpec((1, H), lambda b, qi, ki: (0, 0),
                                   pipeline_mode=pl.Buffered(1))
        else:
            wo_spec = pl.BlockSpec((n_heads, hd, H), lambda b, qi, ki: (0, 0, 0))
            bo_spec = pl.BlockSpec((1, H), lambda b, qi, ki: (0, 0))
        return pl.pallas_call(
            _attn_kernel(n_heads, H, cdt),
            out_shape=jax.ShapeDtypeStruct((B, S, H), query.dtype),
            grid_spec=pltpu.PrefetchScalarGridSpec(
                num_scalar_prefetch=0,
                grid=(B, S // tq, S // tk),
                in_specs=[qp_spec, kv_spec, kv_spec, wo_spec, bo_spec],
                out_specs=pl.BlockSpec((1, tq, H), lambda b, qi, ki: (b, qi, 0)),
                scratch_shapes=[pltpu.VMEM((n_heads, tq, 1), jnp.float32),   # m
                                pltpu.VMEM((n_heads, tq, 1), jnp.float32),   # l
                                pltpu.VMEM((n_heads, tq, hd), jnp.float32)]),  # acc
            compiler_params=pltpu.CompilerParams(
                # batch and q-tile axes are independent (megacore / 2-TC v7x);
                # kv axis carries the online-softmax state -> "arbitrary", last.
                dimension_semantics=("parallel", "parallel", "arbitrary"),
                vmem_limit_bytes=vmem_limit),
        )(qp, kp, vp, wo_h, bo)

    if _SINGLE_BUFFER_CONST:
        try:
            return attn_call(True)
        except Exception:
            # pl.Buffered(1) not supported by this jax/libtpu: fall back to the
            # default double-buffered constant blocks (few MB of extra VMEM).
            _SINGLE_BUFFER_CONST = False
    return attn_call(False)


# ----------------------------------------------------------------------------
# Pure-JAX reference + test harness
# ----------------------------------------------------------------------------

def _reference_mha(query, key, value, params, n_heads):
    """Pure-JAX f32 reference reproducing the PyTorch forward (eval mode)."""
    B, S, H = query.shape
    hd = H // n_heads

    def lin(x, w, b):
        return x @ w.T + b

    qp = lin(query, params["wq"], params["bq"])
    kp = lin(key, params["wk"], params["bk"])
    vp = lin(value, params["wv"], params["bv"])

    def split(x):  # [B,S,H] -> [B,nh,S,hd]
        return x.reshape(B, S, n_heads, hd).transpose(0, 2, 1, 3)

    q, k, v = split(qp), split(kp), split(vp)
    logits = jnp.einsum("bhqd,bhkd->bhqk", q, k) / math.sqrt(hd)
    attn = jax.nn.softmax(logits, axis=-1)
    ctx = jnp.einsum("bhqk,bhkd->bhqd", attn, v)
    ctx = ctx.transpose(0, 2, 1, 3).reshape(B, S, H)
    return lin(ctx, params["wo"], params["bo"])


def _init_params(key, hidden_dim):
    ks = jax.random.split(key, 8)
    s = 0.02
    return {
        "wq": s * jax.random.normal(ks[0], (hidden_dim, hidden_dim), jnp.float32),
        "bq": s * jax.random.normal(ks[1], (hidden_dim,), jnp.float32),
        "wk": s * jax.random.normal(ks[2], (hidden_dim, hidden_dim), jnp.float32),
        "bk": s * jax.random.normal(ks[3], (hidden_dim,), jnp.float32),
        "wv": s * jax.random.normal(ks[4], (hidden_dim, hidden_dim), jnp.float32),
        "bv": s * jax.random.normal(ks[5], (hidden_dim,), jnp.float32),
        "wo": s * jax.random.normal(ks[6], (hidden_dim, hidden_dim), jnp.float32),
        "bo": s * jax.random.normal(ks[7], (hidden_dim,), jnp.float32),
    }


if __name__ == "__main__":
    def _run_case(B, S, H, n_heads, max_q_tile, max_kv_tile, seed):
        root = jax.random.PRNGKey(seed)
        kq, kk, kv, kp = jax.random.split(root, 4)
        query = jax.random.normal(kq, (B, S, H), jnp.float32)
        key_in = jax.random.normal(kk, (B, S, H), jnp.float32)
        value = jax.random.normal(kv, (B, S, H), jnp.float32)
        params = _init_params(kp, H)

        out = multi_head_attention(query, key_in, value, params, n_heads,
                                   max_q_tile=max_q_tile, max_kv_tile=max_kv_tile)
        out = jax.block_until_ready(out)

        ref = _reference_mha(query, key_in, value, params, n_heads)
        assert out.shape == (B, S, H)
        # bf16 MXU inputs + f32 accumulation + approx reciprocal -> relaxed tol.
        assert jnp.allclose(out, ref, atol=2e-2, rtol=2e-2), "mismatch vs reference"

    # Spec-sized toy case (single q/kv tile covers the whole sequence).
    _run_case(B=2, S=8, H=32, n_heads=4, max_q_tile=128, max_kv_tile=256, seed=0)
    # Exercises q tiling and the online-softmax accumulation over KV tiles.
    _run_case(B=2, S=128, H=128, n_heads=4, max_q_tile=64, max_kv_tile=64, seed=1)

    print("KERNEL_OK")
</pallas_src>

<mosaic_0001>
module attributes {stable_mosaic.version = 11 : i64} {
  func.func @_proj_kernel(%arg0: i32, %arg1: i32, %arg2: i32, %arg3: memref<1x8x32xbf16, #tpu.memory_space<vmem>>, %arg4: memref<1x8x32xbf16, #tpu.memory_space<vmem>>, %arg5: memref<1x8x32xbf16, #tpu.memory_space<vmem>>, %arg6: memref<1x32x8xbf16, #tpu.memory_space<vmem>>, %arg7: memref<1x1x8xf32, #tpu.memory_space<vmem>>, %arg8: memref<1x32x8xbf16, #tpu.memory_space<vmem>>, %arg9: memref<1x1x8xf32, #tpu.memory_space<vmem>>, %arg10: memref<1x32x8xbf16, #tpu.memory_space<vmem>>, %arg11: memref<1x1x8xf32, #tpu.memory_space<vmem>>, %arg12: memref<1x1x8x8xbf16, #tpu.memory_space<vmem>>, %arg13: memref<1x1x8x8xbf16, #tpu.memory_space<vmem>>, %arg14: memref<1x1x8x8xbf16, #tpu.memory_space<vmem>>) attributes {dimension_semantics = [#tpu.dimension_semantics<parallel>, #tpu.dimension_semantics<parallel>, #tpu.dimension_semantics<arbitrary>], iteration_bounds = array<i64: 2, 1, 4>, scalar_prefetch = 0 : i64, scratch_operands = 0 : i64, tpu.core_type = #tpu.core_type<tc>, window_params = [{transform_indices = @transform_0, window_bounds = array<i64: 1, 8, 32>}, {transform_indices = @transform_1, window_bounds = array<i64: 1, 8, 32>}, {transform_indices = @transform_2, window_bounds = array<i64: 1, 8, 32>}, {transform_indices = @transform_3, window_bounds = array<i64: 1, 32, 8>}, {transform_indices = @transform_4, window_bounds = array<i64: 1, 1, 8>}, {transform_indices = @transform_5, window_bounds = array<i64: 1, 32, 8>}, {transform_indices = @transform_6, window_bounds = array<i64: 1, 1, 8>}, {transform_indices = @transform_7, window_bounds = array<i64: 1, 32, 8>}, {transform_indices = @transform_8, window_bounds = array<i64: 1, 1, 8>}, {transform_indices = @transform_9, window_bounds = array<i64: 1, 1, 8, 8>}, {transform_indices = @transform_10, window_bounds = array<i64: 1, 1, 8, 8>}, {transform_indices = @transform_11, window_bounds = array<i64: 1, 1, 8, 8>}]} {
    %c0 = arith.constant 0 : index
    %c0_0 = arith.constant 0 : index
    %c0_1 = arith.constant 0 : index
    %0 = vector.load %arg3[%c0, %c0_0, %c0_1] : memref<1x8x32xbf16, #tpu.memory_space<vmem>>, vector<1x8x32xbf16>
    %1 = vector.shape_cast %0 : vector<1x8x32xbf16> to vector<8x32xbf16>
    %c0_2 = arith.constant 0 : index
    %c0_3 = arith.constant 0 : index
    %c0_4 = arith.constant 0 : index
    %2 = vector.load %arg6[%c0_2, %c0_3, %c0_4] : memref<1x32x8xbf16, #tpu.memory_space<vmem>>, vector<1x32x8xbf16>
    %3 = vector.shape_cast %2 : vector<1x32x8xbf16> to vector<32x8xbf16>
    %cst = arith.constant dense<0.000000e+00> : vector<8x8xf32>
    %4 = tpu.matmul %1, %3, %cst {dimension_numbers = #tpu.dot_dimension_numbers<[1], [0], [0], [1], [0, 0, 1, 1], [], []>} : vector<8x32xbf16>, vector<32x8xbf16>, vector<8x8xf32> -> vector<8x8xf32>
    %c0_5 = arith.constant 0 : index
    %c0_6 = arith.constant 0 : index
    %c0_7 = arith.constant 0 : index
    %5 = vector.load %arg7[%c0_5, %c0_6, %c0_7] : memref<1x1x8xf32, #tpu.memory_space<vmem>>, vector<1x1x8xf32>
    %6 = vector.shape_cast %5 : vector<1x1x8xf32> to vector<1x8xf32>
    %7 = vector.broadcast %6 : vector<1x8xf32> to vector<8x8xf32>
    %8 = arith.addf %4, %7 : vector<8x8xf32>
    %9 = arith.truncf %8 : vector<8x8xf32> to vector<8x8xbf16>
    %c0_8 = arith.constant 0 : index
    %c0_9 = arith.constant 0 : index
    %c0_10 = arith.constant 0 : index
    %c0_11 = arith.constant 0 : index
    %10 = vector.load %arg12[%c0_8, %c0_9, %c0_10, %c0_11] : memref<1x1x8x8xbf16, #tpu.memory_space<vmem>>, vector<1x1x8x8xbf16>
    %11 = vector.shape_cast %10 : vector<1x1x8x8xbf16> to vector<8x8xbf16>
    %12 = vector.shape_cast %9 : vector<8x8xbf16> to vector<1x1x8x8xbf16>
    tpu.vector_store %arg12[%c0_8, %c0_9, %c0_10, %c0_11], %12 {strides = array<i32>} : memref<1x1x8x8xbf16, #tpu.memory_space<vmem>>, vector<1x1x8x8xbf16>,
    %c0_12 = arith.constant 0 : index
    %c0_13 = arith.constant 0 : index
    %c0_14 = arith.constant 0 : index
    %13 = vector.load %arg4[%c0_12, %c0_13, %c0_14] : memref<1x8x32xbf16, #tpu.memory_space<vmem>>, vector<1x8x32xbf16>
    %14 = vector.shape_cast %13 : vector<1x8x32xbf16> to vector<8x32xbf16>
    %c0_15 = arith.constant 0 : index
    %c0_16 = arith.constant 0 : index
    %c0_17 = arith.constant 0 : index
    %15 = vector.load %arg8[%c0_15, %c0_16, %c0_17] : memref<1x32x8xbf16, #tpu.memory_space<vmem>>, vector<1x32x8xbf16>
    %16 = vector.shape_cast %15 : vector<1x32x8xbf16> to vector<32x8xbf16>
    %cst_18 = arith.constant dense<0.000000e+00> : vector<8x8xf32>
    %17 = tpu.matmul %14, %16, %cst_18 {dimension_numbers = #tpu.dot_dimension_numbers<[1], [0], [0], [1], [0, 0, 1, 1], [], []>} : vector<8x32xbf16>, vector<32x8xbf16>, vector<8x8xf32> -> vector<8x8xf32>
    %c0_19 = arith.constant 0 : index
    %c0_20 = arith.constant 0 : index
    %c0_21 = arith.constant 0 : index
    %18 = vector.load %arg9[%c0_19, %c0_20, %c0_21] : memref<1x1x8xf32, #tpu.memory_space<vmem>>, vector<1x1x8xf32>
    %19 = vector.shape_cast %18 : vector<1x1x8xf32> to vector<1x8xf32>
    %20 = vector.broadcast %19 : vector<1x8xf32> to vector<8x8xf32>
    %21 = arith.addf %17, %20 : vector<8x8xf32>
    %22 = arith.truncf %21 : vector<8x8xf32> to vector<8x8xbf16>
    %c0_22 = arith.constant 0 : index
    %c0_23 = arith.constant 0 : index
    %c0_24 = arith.constant 0 : index
    %c0_25 = arith.constant 0 : index
    %23 = vector.load %arg13[%c0_22, %c0_23, %c0_24, %c0_25] : memref<1x1x8x8xbf16, #tpu.memory_space<vmem>>, vector<1x1x8x8xbf16>
    %24 = vector.shape_cast %23 : vector<1x1x8x8xbf16> to vector<8x8xbf16>
    %25 = vector.shape_cast %22 : vector<8x8xbf16> to vector<1x1x8x8xbf16>
    tpu.vector_store %arg13[%c0_22, %c0_23, %c0_24, %c0_25], %25 {strides = array<i32>} : memref<1x1x8x8xbf16, #tpu.memory_space<vmem>>, vector<1x1x8x8xbf16>,
    %c0_26 = arith.constant 0 : index
    %c0_27 = arith.constant 0 : index
    %c0_28 = arith.constant 0 : index
    %26 = vector.load %arg5[%c0_26, %c0_27, %c0_28] : memref<1x8x32xbf16, #tpu.memory_space<vmem>>, vector<1x8x32xbf16>
    %27 = vector.shape_cast %26 : vector<1x8x32xbf16> to vector<8x32xbf16>
    %c0_29 = arith.constant 0 : index
    %c0_30 = arith.constant 0 : index
    %c0_31 = arith.constant 0 : index
    %28 = vector.load %arg10[%c0_29, %c0_30, %c0_31] : memref<1x32x8xbf16, #tpu.memory_space<vmem>>, vector<1x32x8xbf16>
    %29 = vector.shape_cast %28 : vector<1x32x8xbf16> to vector<32x8xbf16>
    %cst_32 = arith.constant dense<0.000000e+00> : vector<8x8xf32>
    %30 = tpu.matmul %27, %29, %cst_32 {dimension_numbers = #tpu.dot_dimension_numbers<[1], [0], [0], [1], [0, 0, 1, 1], [], []>} : vector<8x32xbf16>, vector<32x8xbf16>, vector<8x8xf32> -> vector<8x8xf32>
    %c0_33 = arith.constant 0 : index
    %c0_34 = arith.constant 0 : index
    %c0_35 = arith.constant 0 : index
    %31 = vector.load %arg11[%c0_33, %c0_34, %c0_35] : memref<1x1x8xf32, #tpu.memory_space<vmem>>, vector<1x1x8xf32>
    %32 = vector.shape_cast %31 : vector<1x1x8xf32> to vector<1x8xf32>
    %33 = vector.broadcast %32 : vector<1x8xf32> to vector<8x8xf32>
    %34 = arith.addf %30, %33 : vector<8x8xf32>
    %35 = arith.truncf %34 : vector<8x8xf32> to vector<8x8xbf16>
    %c0_36 = arith.constant 0 : index
    %c0_37 = arith.constant 0 : index
    %c0_38 = arith.constant 0 : index
    %c0_39 = arith.constant 0 : index
    %36 = vector.load %arg14[%c0_36, %c0_37, %c0_38, %c0_39] : memref<1x1x8x8xbf16, #tpu.memory_space<vmem>>, vector<1x1x8x8xbf16>
    %37 = vector.shape_cast %36 : vector<1x1x8x8xbf16> to vector<8x8xbf16>
    %38 = vector.shape_cast %35 : vector<8x8xbf16> to vector<1x1x8x8xbf16>
    tpu.vector_store %arg14[%c0_36, %c0_37, %c0_38, %c0_39], %38 {strides = array<i32>} : memref<1x1x8x8xbf16, #tpu.memory_space<vmem>>, vector<1x1x8x8xbf16>,
    return
  }
  func.func @transform_0(%arg0: i32, %arg1: i32, %arg2: i32) -> (i32, i32, i32) {
    %c0_i32 = arith.constant 0 : i32
    %c0_i32_0 = arith.constant 0 : i32
    return %arg0, %arg1, %c0_i32 : i32, i32, i32
  }
  func.func @transform_1(%arg0: i32, %arg1: i32, %arg2: i32) -> (i32, i32, i32) {
    %c0_i32 = arith.constant 0 : i32
    %c0_i32_0 = arith.constant 0 : i32
    return %arg0, %arg1, %c0_i32 : i32, i32, i32
  }
  func.func @transform_2(%arg0: i32, %arg1: i32, %arg2: i32) -> (i32, i32, i32) {
    %c0_i32 = arith.constant 0 : i32
    %c0_i32_0 = arith.constant 0 : i32
    return %arg0, %arg1, %c0_i32 : i32, i32, i32
  }
  func.func @transform_3(%arg0: i32, %arg1: i32, %arg2: i32) -> (i32, i32, i32) {
    %c0_i32 = arith.constant 0 : i32
    %c0_i32_0 = arith.constant 0 : i32
    %c0_i32_1 = arith.constant 0 : i32
    return %arg2, %c0_i32, %c0_i32_0 : i32, i32, i32
  }
  func.func @transform_4(%arg0: i32, %arg1: i32, %arg2: i32) -> (i32, i32, i32) {
    %c0_i32 = arith.constant 0 : i32
    %c0_i32_0 = arith.constant 0 : i32
    %c0_i32_1 = arith.constant 0 : i32
    return %arg2, %c0_i32, %c0_i32_0 : i32, i32, i32
  }
  func.func @transform_5(%arg0: i32, %arg1: i32, %arg2: i32) -> (i32, i32, i32) {
    %c0_i32 = arith.constant 0 : i32
    %c0_i32_0 = arith.constant 0 : i32
    %c0_i32_1 = arith.constant 0 : i32
    return %arg2, %c0_i32, %c0_i32_0 : i32, i32, i32
  }
  func.func @transform_6(%arg0: i32, %arg1: i32, %arg2: i32) -> (i32, i32, i32) {
    %c0_i32 = arith.constant 0 : i32
    %c0_i32_0 = arith.constant 0 : i32
    %c0_i32_1 = arith.constant 0 : i32
    return %arg2, %c0_i32, %c0_i32_0 : i32, i32, i32
  }
  func.func @transform_7(%arg0: i32, %arg1: i32, %arg2: i32) -> (i32, i32, i32) {
    %c0_i32 = arith.constant 0 : i32
    %c0_i32_0 = arith.constant 0 : i32
    %c0_i32_1 = arith.constant 0 : i32
    return %arg2, %c0_i32, %c0_i32_0 : i32, i32, i32
  }
  func.func @transform_8(%arg0: i32, %arg1: i32, %arg2: i32) -> (i32, i32, i32) {
    %c0_i32 = arith.constant 0 : i32
    %c0_i32_0 = arith.constant 0 : i32
    %c0_i32_1 = arith.constant 0 : i32
    return %arg2, %c0_i32, %c0_i32_0 : i32, i32, i32
  }
  func.func @transform_9(%arg0: i32, %arg1: i32, %arg2: i32) -> (i32, i32, i32, i32) {
    %c0_i32 = arith.constant 0 : i32
    %c0_i32_0 = arith.constant 0 : i32
    return %arg0, %arg2, %arg1, %c0_i32 : i32, i32, i32, i32
  }
  func.func @transform_10(%arg0: i32, %arg1: i32, %arg2: i32) -> (i32, i32, i32, i32) {
    %c0_i32 = arith.constant 0 : i32
    %c0_i32_0 = arith.constant 0 : i32
    return %arg0, %arg2, %arg1, %c0_i32 : i32, i32, i32, i32
  }
  func.func @transform_11(%arg0: i32, %arg1: i32, %arg2: i32) -> (i32, i32, i32, i32) {
    %c0_i32 = arith.constant 0 : i32
    %c0_i32_0 = arith.constant 0 : i32
    return %arg0, %arg2, %arg1, %c0_i32 : i32, i32, i32, i32
  }
}

</mosaic_0001>

<bundles_post_ra>
// kernel: tpu_custom_call.1
= control target key start
LH: loop header
LB: loop body
LE: loop exit
PB: predicated region body
PF: predicated region fallthrough
CT: control target
= control target key end

     0   :  { %s1757_s0 = inlined_call_operand.vmem [shape: bf16[2,8,32], index: 0, kind: input, shape index: {}]   ;;  %s1758_s1 = inlined_call_operand.vmem [shape: bf16[2,8,32], index: 1, kind: input, shape index: {}]   ;;  %s1759_s2 = inlined_call_operand.vmem [shape: bf16[2,8,32], index: 2, kind: input, shape index: {}]   ;;  %s1760_s3 = inlined_call_operand.vmem [shape: bf16[4,32,8], index: 3, kind: input, shape index: {}]   ;;  %s1761_s4 = inlined_call_operand.vmem [shape: f32[4,1,8], index: 4, kind: input, shape index: {}]   ;;  %s1762_s5 = inlined_call_operand.vmem [shape: bf16[4,32,8], index: 5, kind: input, shape index: {}]   ;;  %s1763_s6 = inlined_call_operand.vmem [shape: f32[4,1,8], index: 6, kind: input, shape index: {}]   ;;  %s1764_s7 = inlined_call_operand.vmem [shape: bf16[4,32,8], index: 7, kind: input, shape index: {}]   ;;  %s1765_s8 = inlined_call_operand.vmem [shape: f32[4,1,8], index: 8, kind: input, shape index: {}]   ;;  %s1766_s9 = inlined_call_operand.hbm [shape: bf16[2,4,8,8], index: 9, kind: output, shape index: {0}]   ;;  %s1767_s10 = inlined_call_operand.hbm [shape: bf16[2,4,8,8], index: 10, kind: output, shape index: {1}]   ;;  %s1768_s11 = inlined_call_operand.hbm [shape: bf16[2,4,8,8], index: 11, kind: output, shape index: {2}]  }
   0x1   :  { %1781 = sst [smem:[#allocation17_spill]] %s1767_s10 }
   0x2   :  { %1782 = sst [smem:[#allocation18_spill]] %s1768_s11 }
   0x3   :  { %17 = vsyncpa [#allocation3], 0 }
   0x4   :  { %19 = vsyncpa [#allocation3 + $0x1], 0 }
   0x5   :  { %20 = vsyncpa [#allocation5], 0 }
   0x6   :  { %22 = vsyncpa [#allocation5 + $0x1], 0  ;;  %s1494_s17 = smov 0   ;;  %s1496_s18 = smov 0  }
   0x7   :  { %s1498_s19 = smov 0   ;;  %s1500_s20 = smov 0  }
   0x8   :  { %s1502_s21 = smov 0   ;;  %s1504_s22 = smov 0  }
   0x9   :  { %s1506_s23 = smov 0   ;;  %s1508_s24 = smov 0  }
   0xa LB: > { %1783 = sst [smem:[#allocation9_spill]] %s1399_s17  ;;  %s1770_s25 = sadd.s32 4294967295, %s1427_s24   ;;  %s1427_s24 = sphi %s1508_s24, %s28_s24   ;;  %s1423_s23 = sphi %s1506_s23, %s1806_s23   ;;  %s1419_s22 = sphi %s1504_s22, %s1805_s22   ;;  %s1415_s21 = sphi %s1502_s21, %s1804_s21   ;;  %s1411_s20 = sphi %s1500_s20, %s1803_s20   ;;  %s1407_s19 = sphi %s1498_s19, %s1802_s19   ;;  %s1403_s18 = sphi %s1496_s18, %s1808_s18   ;;  %s1399_s17 = sphi %s1494_s17, %s1807_s17  }
   0xb   : > { %1784 = sst [smem:[#allocation10_spill]] %s1407_s19  ;;  %s1769_s26 = sadd.s32 4294967294, %s1427_s24  }
   0xc   : > { %1785 = sst [smem:[#allocation11_spill]] %s1419_s22  ;;  %s40_s27 = sadd.s32 1, %s1419_s22 }
   0xd   : > { %1786 = sst [smem:[#allocation12_spill]] %s1423_s23  ;;  %p41_p0 = scmp.ge.s32.totalorder %s40_s27, 4 }
   0xe   : > { %s47_s28 = sadd.s32 1, %s1423_s23  ;;  %p308_p1 = scmp.ne.s32.totalorder %s1407_s19, %s1403_s18 }
   0xf   : > { %p309_p2 = scmp.eq.s32.totalorder %s1770_s25, 7  ;;  %s1810_s27 = smov (%p41_p0, %s40_s27), 0 }
  0x10   : > { %1787 = sst [smem:[#allocation13_spill]] %s1810_s27  ;;  %s1812_s28 = smov (!%p41_p0, %s47_s28), %s1423_s23 }
  0x11   : > { %s292_s29 = ssub.s32 %s1419_s22, %s1810_s27  ;;  %p1547_p3 = por %p309_p2, %p308_p1 }
  0x12   : > { %p49_p4 = scmp.ge.s32.totalorder %s1812_s28, 2  ;;  %p314_p5 = scmp.ne.s32.totalorder %s1403_s18, %s1399_s17 }
  0x13   : > { %p315_p6 = scmp.eq.s32.totalorder %s1769_s26, 7  ;;  %p1112_p7 = scmp.ge.s32.totalorder %s1427_s24, 1 }
  0x14   : > { %s1814_s28 = smov (%p49_p4, %s1812_s28), 0  ;;  %p465_p9 = scmp.lt.s32.totalorder %s1427_s24, 9 }
  0x15   : > { %1789 = sst [smem:[#allocation14_spill]] %s1814_s28  ;;  %p1558_p8 = por %p315_p6, %p314_p5 }
  0x16   : > { %s291_s13 = ssub.s32 %s1423_s23, %s1814_s28  ;;  %s298_s14 = sadd.s32 1, %s1407_s19 }
  0x17   : > { %s1790_s12 = scalar_select %p1558_p8, 1, 0 }
  0x18   : > { %s293_s15 = sor.u32 %s292_s29, %s291_s13  ;;  %p466_p10 = pnand %p1112_p7, %p465_p9 }
  0x19   : > { %1791 = sst [smem:[#allocation15_spill]] %s1790_s12  ;;  %p296_p11 = scmp.eq.s32.totalorder %s293_s15, 0  ;;  %v1429_v0 = vmov (!%p466_p10), 0.0   ;;  %vm1430_vm0 = vmmov (!%p466_p10), 0   ;;  %vm625_vm1 = vcmask (!%p466_p10), 261120   ;;  %vm670_vm2 = vcmask (!%p466_p10), 60416  }
  0x1a   : > { %469 = sbr.rel (%p466_p10) target bundleno = 323 (0x143), region = 56  ;;  %p576_p12 = scmp.lt.s32.totalorder (!%p466_p10), %s1411_s20, 3  ;;  %1160 = vmatprep.subr.bf16.mxu0 (!%p466_p10), %v1429_v0  ;;  %1168 = vmatprep.subr.bf16.mxu1 (!%p466_p10), %v1429_v0 }
  0x1b   : > { %s1567_s16 = scalar_select %p296_p11, %s1407_s19, %s298_s14  }
  0x1c   : > { %p555_p13 = scmp.lt.s32.totalorder (!%p466_p10), %s1415_s21, 1  ;;  %1164 = vmatprep.mubr.msk.bf16.mxu0 (!%p466_p10), %vm1430_vm0, %v1429_v0  ;;  %1172 = vmatprep.mubr.msk.bf16.mxu1 (!%p466_p10), %vm1430_vm0, %v1429_v0  ;;  %s538_s19 = sand.u32 (!%p466_p10), 1, %s1403_s18  }
  0x1d   : > { %1792 = sst [smem:[#allocation16_spill]] %s1567_s16 }
  0x21   : > { %s1572_s26 = scalar_select %p576_p12, %s1411_s20, 3 }
  0x22   : > { %s556_s29 = scalar_select %p555_p13, %s1415_s21, 1 }
  0x23   : > { %s1148_s13 = sshll.u32 %s1572_s26, 4  ;;  %s583_s16 = scalar_lea.vmem %s1761_s4, %s1572_s26 }
  0x24   : > { %s580_s25 = scalar_lea.vmem %s1760_s3, %s1148_s13  ;;  %s588_s23 = scalar_lea.vmem %s1762_s5, %s1148_s13  ;;  %v1125_v10 = vld [vmem:[%s583_s16] ss:$0 sm:$0xff] }
  0x25   : > { %v1267_v1 = vld [vmem:[%s580_s25] sm:$0xff]   ;;  %s1116_s22 = sshll.u32 %s556_s29, 2  ;;  %v1268_v2 = vld [vmem:[%s580_s25 + $0x8] sm:$0xff]   ;;  %s596_s12 = scalar_lea.vmem %s1764_s7, %s1148_s13 }
  0x26   : > { %1161 = vmatpush3.bf16.msra.mxu0 %v1267_v1  ;;  %v1269_v3 = vld [vmem:[%s588_s23] sm:$0xff]   ;;  %s561_s10 = scalar_lea.vmem %s1757_s0, %s1116_s22  ;;  %v1271_v4 = vld [vmem:[%s588_s23 + $0x8] sm:$0xff]   ;;  %s568_s27 = scalar_lea.vmem %s1758_s1, %s1116_s22 }
  0x27   : > { %1162 = vmatprep.subr.bf16.mxu0 %v1429_v0  ;;  %1169 = vmatpush3.bf16.msra.mxu1 %v1269_v3  ;;  %v601_v5 = vld [vmem:[%s561_s10] sm:$0xf]  ;;  %v1272_v8 = vld [vmem:[%s596_s12 + $0x8] sm:$0xff]   ;;  %s575_s17 = scalar_lea.vmem %s1759_s2, %s1116_s22  ;;  %s1140_s23 = sshll.u32 %s1415_s21, 2 }
  0x28   : > { %1170 = vmatprep.subr.bf16.mxu1 %v1429_v0  ;;  %v1270_v6 = vld [vmem:[%s596_s12] sm:$0xff]   ;;  %s1605_s12 = sshll.u32 %s538_s19, 2  ;;  %s591_s22 = scalar_lea.vmem %s1763_s6, %s1572_s26 }
  0x29   : > { %v672_v7 = vld [vmem:[%s568_s27] sm:$0xf]  ;;  %s833_s14 = sadd.s32 %s1411_s20, %s1140_s23  ;;  %s540_s21 = scalar_lea.vmem [#allocation2], %s1605_s12 }
  0x2a   : > { %1163 = vmatpush3.bf16.msra.mxu0 %v1268_v2  ;;  %v741_v9 = vld [vmem:[%s575_s17] sm:$0xf]  ;;  %s1612_s15 = sshll.u32 %s833_s14, 6  ;;  %s837_s27 = sshll.u32 %s540_s21, 4  ;;  %s1632_s27 = int_to_ptr.vmem [resolvable:$true] %s837_s27 }
  0x2b   : > { %1176 = vmatprep.subr.bf16.mxu0 %v1429_v0  ;;  %1171 = vmatpush3.bf16.msra.mxu1 %v1271_v4  ;;  %v1129_v12 = vld [vmem:[%s591_s22] ss:$0 sm:$0xff]  ;;  %s599_s17 = scalar_lea.vmem %s1765_s8, %s1572_s26  ;;  %s1793_s25 = sadd.s32 4294967295, %s1427_s24  }
  0x2c   : > { %s1621_s28 = sand.u32 1, %s1793_s25   ;;  %s1780_s20 = scalar_lea.vmem [#allocation4], %s1605_s12  ;;  %v1133_v24 = vld [vmem:[%s599_s17] ss:$0 sm:$0xff] }
  0x2d   : > { %1165 = vmatmul.mubr.msk.bf16.vlgmr.msra.gmra.mrb[0].mxu0 %vm625_vm1, %v601_v5  ;;  %s853_s23 = sshll.u32 %s1780_s20, 4  ;;  %s1630_s26 = scalar_lea.hbm %s1766_s9, %s1612_s15  ;;  %s1640_s23 = int_to_ptr.vmem [resolvable:$true] %s853_s23 }
  0x2e   : > { %1177 = vmatpush3.bf16.msra.mxu0 %v1270_v6  ;;  %1180 = vmatprep.mubr.msk.bf16.mxu0 %vm1430_vm0, %v1429_v0  ;;  %s1794_s14 = sld [smem:[#allocation17_spill]]  ;;  %s811_s10 = scalar_lea.sflag [#allocation3], %s538_s19 }
  0x2f   : > { %1178 = vmatprep.subr.bf16.mxu0 %v1429_v0  ;;  %1173 = vmatmul.mubr.msk.bf16.vlgmr.msra.gmra.mrb[0].mxu1 %vm625_vm1, %v672_v7  ;;  %s1273_s25 = scalar_lea.vmem %s1632_s27, 64  ;;  %s1431_s16 = smov [#allocation2]  }
  0x30   : > { %p1274_p0 = scmp.ne.s32.totalorder %s1632_s27, %s1273_s25  ;;  %s1277_s29 = sshll.u32 %s1431_s16, 4  ;;  %s1278_s29 = int_to_ptr.vmem [resolvable:$false] %s1277_s29 }
  0x31   : > { %s1279_s20 = scalar_lea.vmem %s1278_s29, 128  ;;  %p1280_p4 = scmp.lt.s32.totalorder %s1632_s27, %s1278_s29 }
  0x32   : > { %1179 = vmatpush3.bf16.msra.mxu0 %v1272_v8  ;;  %p1275_p1 = pnand %p1274_p0, %p1547_p3  ;;  %p1281_p5 = scmp.lt.s32.totalorder %s1279_s20, %s1273_s25 }
  0x34   : > { %s1638_s11 = scalar_lea.hbm %s1794_s14, %s1612_s15  ;;  %p1276_p2 = pneg %p1275_p1 }
  0x35   : > { %1181 = vmatmul.mubr.msk.bf16.vlgmr.msra.gmra.mrb[4].mxu0 %vm625_vm1, %v741_v9  ;;  %p1282_p6 = por %p1281_p5, %p1280_p4 }
  0x37   : > { %p1283_p7 = pnand %p1282_p6, %p1276_p2 }
 0x100   : > { %v663_v11 = vpop.f32.mrb[0].mxu0 }
 0x101   : > { %v664_v13 = vadd.f32 %v1125_v10, %v663_v11  ;;  %v1166_v14 = vpop.f32.mrb[1].mxu0 }
 0x102   : > { %v666_v15 = vpop.f32.mrb[2].mxu0  ;;  %v733_v16 = vpop.f32.mrb[0].mxu1 }
 0x103   : > { %v669_v17 = vpack.c.bf16 %v664_v13, %v664_v13  ;;  %v1167_v18 = vpop.f32.mrb[3].mxu0  ;;  %v734_v19 = vadd.f32 %v1129_v12, %v733_v16  ;;  %v1174_v20 = vpop.f32.mrb[1].mxu1 }
 0x104   : > { %v736_v21 = vpop.f32.mrb[2].mxu1 }
 0x105   : > { %v739_v22 = vpack.c.bf16 %v734_v19, %v734_v19  ;;  %v1175_v23 = vpop.f32.mrb[3].mxu1  ;;  %671 = vst.msk [vmem:[%s540_s21] sm:$0xf] %vm670_vm2, %v669_v17 }
 0x106   : > { %1286 = shalt.err (!%p1283_p7)
}
 0x107   : > { %s1287_s19 = scalar_lea.hbm %s1630_s26, 64  ;;  %s1291_s13 = scalar_lea.hbm %s1766_s9, 512 }
 0x108   : > { %p1288_p9 = scmp.ne.s32.totalorder %s1630_s26, %s1287_s19  ;;  %p1292_p12 = scmp.lt.u32.totalorder %s1630_s26, %s1766_s9 }
 0x109   : > { %p1293_p13 = scmp.lt.u32.totalorder %s1291_s13, %s1287_s19  ;;  %p1295_p1 = scmp.lt.u32.totalorder %s1287_s19, %s1630_s26 }
 0x10a   : > { %p1289_p10 = pnand %p1288_p9, %p1547_p3 }
 0x10b   : > { %p1294_p0 = por %p1293_p13, %p1292_p12 }
 0x10c   : > { %p1290_p11 = pneg %p1289_p10 }
 0x10d   : > { %p1296_p2 = por %p1295_p1, %p1294_p0 }
 0x10f   : > { %p1297_p4 = pnand %p1296_p2, %p1290_p11 }
 0x111   : > { %1300 = shalt.err (!%p1297_p4)
}
 0x112   : > { %1184 = dma.vmem_to_hbm [thread:$0]  (%p1547_p3), %s1632_s27, 64, %s1630_s26, %s811_s10   ;;  %v802_v25 = vpop.f32.mrb[4].mxu0 }
 0x113   : > { %s1795_s20 = scalar_lea.vmem [#allocation4], %s1605_s12  ;;  %s554_s25 = scalar_lea.vmem [#allocation6], %s1605_s12 }
 0x114   : > { %740 = vst.msk [vmem:[%s1795_s20] sm:$0xf] %vm670_vm2, %v739_v22  ;;  %s1672_s29 = sshll.u32 %s554_s25, 4  ;;  %s816_s19 = scalar_lea.sflag [#allocation5], %s1621_s28  ;;  %s870_s29 = int_to_ptr.vmem [resolvable:$true] %s1672_s29 }
 0x115   : > { %s1301_s21 = scalar_lea.vmem %s1640_s23, 64  ;;  %s1432_s17 = smov [#allocation4]  }
 0x116   : > { %p1302_p5 = scmp.ne.s32.totalorder %s1640_s23, %s1301_s21  ;;  %s1305_s13 = sshll.u32 %s1432_s17, 4  ;;  %s1306_s13 = int_to_ptr.vmem [resolvable:$false] %s1305_s13 }
 0x117   : > { %s1307_s22 = scalar_lea.vmem %s1306_s13, 128  ;;  %p1308_p9 = scmp.lt.s32.totalorder %s1640_s23, %s1306_s13 }
 0x118   : > { %p1303_p6 = pnand %p1302_p5, %p1547_p3  ;;  %p1309_p10 = scmp.lt.s32.totalorder %s1307_s22, %s1301_s21 }
 0x11a   : > { %p1304_p7 = pneg %p1303_p6  ;;  %p1310_p11 = por %p1309_p10, %p1308_p9 }
 0x11c   : > { %p1311_p12 = pnand %p1310_p11, %p1304_p7 }
 0x11e   : > { %1314 = shalt.err (!%p1311_p12)
}
 0x11f   : > { %s1315_s27 = scalar_lea.hbm %s1638_s11, 64  ;;  %s1319_s16 = scalar_lea.hbm %s1794_s14, 512 }
 0x120   : > { %p1316_p13 = scmp.ne.s32.totalorder %s1638_s11, %s1315_s27  ;;  %p1320_p2 = scmp.lt.u32.totalorder %s1638_s11, %s1794_s14 }
 0x121   : > { %p1321_p4 = scmp.lt.u32.totalorder %s1319_s16, %s1315_s27  ;;  %p1323_p6 = scmp.lt.u32.totalorder %s1315_s27, %s1638_s11 }
 0x122   : > { %p1317_p0 = pnand %p1316_p13, %p1547_p3 }
 0x123   : > { %p1322_p5 = por %p1321_p4, %p1320_p2 }
 0x124   : > { %p1318_p1 = pneg %p1317_p0 }
 0x125   : > { %p1324_p7 = por %p1323_p6, %p1322_p5 }
 0x127   : > { %p1325_p9 = pnand %p1324_p7, %p1318_p1 }
 0x129   : > { %1328 = shalt.err (!%p1325_p9)
}
 0x12a   : > { %1185 = dma.vmem_to_hbm [thread:$0]  (%p1547_p3), %s1640_s23, 64, %s1638_s11, %s816_s19   ;;  %v803_v26 = vadd.f32 %v1133_v24, %v802_v25  ;;  %v1182_v27 = vpop.f32.mrb[5].mxu0 }
 0x12b   : > { %v805_v28 = vpop.f32.mrb[6].mxu0  ;;  %s1796_s22 = sld [smem:[#allocation18_spill]]  ;;  %s1329_s10 = scalar_lea.vmem %s870_s29, 64 }
 0x12c   : > { %v808_v29 = vpack.c.bf16 %v803_v26, %v803_v26  ;;  %v1183_v30 = vpop.f32.mrb[7].mxu0  ;;  %p1330_p10 = scmp.ne.s32.totalorder %s870_s29, %s1329_s10  ;;  %s1433_s23 = smov [#allocation6]  }
 0x12d   : > { %s1333_s11 = sshll.u32 %s1433_s23, 4  ;;  %s1334_s11 = int_to_ptr.vmem [resolvable:$false] %s1333_s11 }
 0x12e   : > { %809 = vst.msk [vmem:[%s554_s25] sm:$0xf] %vm670_vm2, %v808_v29  ;;  %p1331_p11 = pnand %p1330_p10, %p1547_p3  ;;  %s1335_s16 = scalar_lea.vmem %s1334_s11, 128 }
 0x12f   : > { %p1336_p13 = scmp.lt.s32.totalorder %s870_s29, %s1334_s11  ;;  %p1337_p0 = scmp.lt.s32.totalorder %s1335_s16, %s1329_s10 }
 0x130   : > { %p1332_p12 = pneg %p1331_p11 }
 0x131   : > { %s1797_s27 = smov %s1796_s22  ;;  %s1702_s26 = scalar_lea.hbm %s1796_s22, %s1612_s15 }
 0x132   : > { %p1338_p1 = por %p1337_p0, %p1336_p13 }
 0x134   : > { %p1339_p2 = pnand %p1338_p1, %p1332_p12 }
 0x136   : > { %1342 = shalt.err (!%p1339_p2)
}
 0x137   : > { %s1343_s12 = scalar_lea.hbm %s1702_s26, 64  ;;  %s1347_s20 = scalar_lea.hbm %s1797_s27, 512 }
 0x138   : > { %p1344_p4 = scmp.ne.s32.totalorder %s1702_s26, %s1343_s12  ;;  %p1348_p7 = scmp.lt.u32.totalorder %s1702_s26, %s1797_s27 }
 0x139   : > { %p1349_p9 = scmp.lt.u32.totalorder %s1347_s20, %s1343_s12  ;;  %p1351_p11 = scmp.lt.u32.totalorder %s1343_s12, %s1702_s26 }
 0x13a   : > { %p1345_p5 = pnand %p1344_p4, %p1547_p3 }
 0x13b   : > { %p1350_p10 = por %p1349_p9, %p1348_p7 }
 0x13c   : > { %p1346_p6 = pneg %p1345_p5 }
 0x13d   : > { %p1352_p12 = por %p1351_p11, %p1350_p10 }
 0x13f   : > { %p1353_p13 = pnand %p1352_p12, %p1346_p6 }
 0x141   : > { %1356 = shalt.err (!%p1353_p13)
}
 0x142   : > { %1186 = dma.vmem_to_hbm [thread:$0]  (%p1547_p3), %s870_s29, 64, %s1702_s26, %s816_s19  }
 0x143 PF: > { %s1798_s13 = sld [smem:[#allocation9_spill]]  ;;  %p1200_p0 = scmp.ge.s32.totalorder %s1427_s24, 2 }
 0x145   : > { %p1191_p1 = pnand %p1200_p0, %p1558_p8 }
 0x149   : > { %s881_s10 = sand.u32 1, %s1798_s13  }
 0x14a   : > { %s882_s23 = scalar_lea.sflag [#allocation3], %s881_s10 }
 0x14b   : > { %1390 = dma.done.wait (!%p1191_p1), %s882_s23, 64  }
 0x14c   : > { %1392 = vsyncadd (!%p1191_p1), %s882_s23, 4294967232  ;;  %s1800_s11 = sadd.s32 4294967294, %s1427_s24  }
 0x14d   : > { %s890_s16 = sand.u32 1, %s1800_s11  }
 0x14e   : > { %s891_s12 = scalar_lea.sflag [#allocation5], %s890_s16 }
 0x14f   : > { %1394 = dma.done.wait (!%p1191_p1), %s891_s12, 128  }
 0x150   : > { %1396 = vsyncadd (!%p1191_p1), %s891_s12, 4294967168  ;;  %s28_s24 = sadd.s32 1, %s1427_s24   ;;  %s1801_s30 = sld [smem:[#allocation10_spill]] }
 0x151   : > { %p25_p3 = scmp.ge.s32.totalorder %s28_s24, 10   ;;  %s1802_s19 = sld [smem:[#allocation16_spill]] }
 0x152   : > { %s1803_s20 = sld [smem:[#allocation11_spill]]  ;;  %s1804_s21 = sld [smem:[#allocation12_spill]] }
 0x153   : > { %s1805_s22 = sld [smem:[#allocation13_spill]]  ;;  %s1806_s23 = sld [smem:[#allocation14_spill]] }
 0x154   : > { %s1807_s17 = smov %s1403_s18  ;;  %27 = sbr.rel (!%p25_p3) target bundleno = 10 (0xa), region = 147 }
 0x156   : > { %s1808_s18 = smov %s1801_s30 }
 0x15b   :  { %905 = vsyncpa [#allocation3], 1 }
 0x15c   :  { %907 = vsyncpa [#allocation3 + $0x1], 1 }
 0x15d   :  { %908 = vsyncpa [#allocation5], 1 }
 0x15e   :  { %910 = vsyncpa [#allocation5 + $0x1], 1 }

</bundles_post_ra>
